<compile_context>
chip_gen: v7x
topology: tpu7x:2x2x1
jax: 0.10.0
libtpu: 0.0.40
codegen_flags: <defaults>
</compile_context>

<pallas_src>
import functools

import jax
import jax.numpy as jnp
from jax.experimental import pallas as pl
from jax.experimental.pallas import tpu as pltpu


def aff_kernel(x_ref, y_ref, w1x_ref, w1y_ref, b1_ref, w2_ref, b2_ref, o_ref):
    """One (BB, C, TILE) channels-major slab of pixels.

    x_ref, y_ref : (BB, C, TILE)  x and ds_y activations (f32 or bf16)
    w1x_ref      : (Ci, C) bf16   conv1 weights acting on the x half of concat
    w1y_ref      : (Ci, C) bf16   conv1 weights acting on the ds_y half
    b1_ref       : (Ci, 1) f32    folded conv1 + BN1 bias
    w2_ref       : (C, Ci) bf16   conv2 weights (BN2 scale folded in)
    b2_ref       : (C, 1)  f32    folded conv2 + BN2 bias
    o_ref        : (BB, C, TILE)  output
    """
    # Weights / biases are tiny; load once outside the batch loop.
    w1x = w1x_ref[...]
    w1y = w1y_ref[...]
    b1 = b1_ref[...]
    w2 = w2_ref[...]
    b2 = b2_ref[...]

    bb = x_ref.shape[0]
    for b in range(bb):  # small static unroll; each iteration stays 2-D
        # bf16 operands for the MXU (f32 accumulation).
        x16 = x_ref[b].astype(jnp.bfloat16)
        y16 = y_ref[b].astype(jnp.bfloat16)

        # cat([x, ds_y], channel) -> 1x1 conv (+ folded BN1)
        h = (
            jnp.dot(w1x, x16, preferred_element_type=jnp.float32)
            + jnp.dot(w1y, y16, preferred_element_type=jnp.float32)
            + b1
        )
        h = h * jax.nn.sigmoid(h)  # SiLU (f32 on the EUP/VPU)

        # second 1x1 conv (+ folded BN2); bf16 operand, f32 accumulation.
        z = jnp.dot(w2, h.astype(jnp.bfloat16),
                    preferred_element_type=jnp.float32) + b2
        t = jnp.tanh(z)  # att = 1 + t

        # xo = x*att + ds_y*(2-att) == (x + y) + (x - y)*tanh(z)
        xf = x_ref[b].astype(jnp.float32)
        yf = y_ref[b].astype(jnp.float32)
        o_ref[b] = ((xf + yf) + (xf - yf) * t).astype(o_ref.dtype)


def _cdiv(a, b):
    return -(-a // b)


def _plan(B, C, HW, in_itemsize, out_itemsize, tm):
    """Pick (batch_block, pixel_tile, n_tiles) for the grid."""
    # Pixel (lane) tile: whole spatial extent if it fits, otherwise a
    # lane-dense multiple of 128 with a cdiv grid (partial last tile is safe:
    # every output column depends only on its own input column).
    if HW <= tm:
        tile = HW
    else:
        tile = max(128, (tm // 128) * 128)
    n_tiles = _cdiv(HW, tile)

    # Batch block: aim for ~512 KiB per activation block so per-step overhead
    # and small DMAs stop dominating on small feature maps.
    target_bytes = 512 * 1024
    per_img = C * tile * in_itemsize
    bb = int(max(1, min(B, target_bytes // max(1, per_img))))

    # v7x megacore: prefer >= 2 total grid steps so both TCs get work.
    def steps(bb_, nt_):
        return _cdiv(B, bb_) * nt_

    while bb > 1 and steps(bb, n_tiles) < 2:
        bb = max(1, bb // 2)
    if steps(bb, n_tiles) < 2 and n_tiles == 1 and tile >= 256:
        tile = max(128, ((tile + 255) // 256) * 128)  # split lane axis ~in half
        n_tiles = _cdiv(HW, tile)

    # VMEM guard: double-buffered x/y/out blocks must stay well under 64 MiB
    # (v7x per-TC VMEM).
    def vmem_use(bb_, tile_):
        return 2 * bb_ * C * tile_ * (2 * in_itemsize + out_itemsize)

    while tile > 128 and vmem_use(bb, tile) > (40 << 20):
        tile = max(128, ((tile // 2) // 128) * 128)
        n_tiles = _cdiv(HW, tile)

    return bb, tile, n_tiles


@functools.partial(jax.jit, static_argnames=("tm", "out_dtype"))
def aff_forward(x_nchw, y_nchw, w1xT, w1yT, b1, w2T, b2, *, tm=2048,
                out_dtype=None):
    """AFF forward.  x_nchw/y_nchw: (B, C, H, W) -> (B, C, H, W)."""
    B, C, H, W = x_nchw.shape
    Ci = w1xT.shape[0]
    HW = H * W
    out_dtype = x_nchw.dtype if out_dtype is None else jnp.dtype(out_dtype)

    x3 = x_nchw.reshape(B, C, HW)  # free reshape -- no transpose
    y3 = y_nchw.reshape(B, C, HW)

    in_itemsize = x3.dtype.itemsize
    out_itemsize = jnp.dtype(out_dtype).itemsize

    bb, tile, n_tiles = _plan(B, C, HW, in_itemsize, out_itemsize, tm)
    nb = _cdiv(B, bb)

    # bf16 operands for the MXU; biases stay f32.
    w1x16 = w1xT.astype(jnp.bfloat16)
    w1y16 = w1yT.astype(jnp.bfloat16)
    w216 = w2T.astype(jnp.bfloat16)
    b1f = b1.astype(jnp.float32)
    b2f = b2.astype(jnp.float32)

    slab = pl.BlockSpec((bb, C, tile), lambda b, t: (b, 0, t))
    full = lambda shape: pl.BlockSpec(shape, lambda b, t: (0, 0))

    # Explicit VMEM budget: double-buffered x/y/out blocks + weights + margin.
    blk_bytes = bb * C * tile
    vmem_need = 2 * blk_bytes * (2 * in_itemsize + out_itemsize) \
        + 2 * (2 * C * Ci + Ci + C) * 4
    vmem_limit = int(min(max(2 * vmem_need + (4 << 20), 32 << 20), 48 << 20))

    cost = pl.CostEstimate(
        flops=6 * B * HW * C * Ci + 8 * B * HW * C,
        transcendentals=B * HW * (Ci + C),
        bytes_accessed=B * HW * C * (2 * in_itemsize + out_itemsize)
        + 2 * (2 * C * Ci + Ci + C),
    )

    out3 = pl.pallas_call(
        aff_kernel,
        out_shape=jax.ShapeDtypeStruct((B, C, HW), out_dtype),
        grid_spec=pltpu.PrefetchScalarGridSpec(
            num_scalar_prefetch=0,
            grid=(nb, n_tiles),
            in_specs=[
                slab,            # x slab
                slab,            # ds_y slab
                full((Ci, C)),   # w1x^T (bf16)
                full((Ci, C)),   # w1y^T (bf16)
                full((Ci, 1)),   # b1
                full((C, Ci)),   # w2^T (bf16)
                full((C, 1)),    # b2
            ],
            out_specs=slab,
        ),
        compiler_params=pltpu.CompilerParams(
            dimension_semantics=("parallel", "parallel"),
            vmem_limit_bytes=vmem_limit,
        ),
        cost_estimate=cost,
    )(x3, y3, w1x16, w1y16, b1f, w216, b2f)

    return out3.reshape(B, C, H, W)


def fold_bn(conv_w, conv_b, gamma, beta, mean, var, eps=1e-5):
    """Fold an inference-mode BatchNorm into a preceding 1x1 conv.

    conv_w: (Cin, Cout), conv_b: (Cout,), BN params: (Cout,).
    """
    s = gamma / jnp.sqrt(var + eps)
    return conv_w * s[None, :], (conv_b - mean) * s + beta


def make_params(key, channels=64, r=4):
    """Deterministic synthetic parameters matching AFF.__init__ shapes."""
    ci = channels // r
    ks = jax.random.split(key, 10)
    # conv1: Conv2d(2*channels, ci, 1)
    w1 = jax.random.normal(ks[0], (2 * channels, ci), jnp.float32) * 0.05
    b1 = jax.random.normal(ks[1], (ci,), jnp.float32) * 0.05
    # BN1 (inference stats, non-trivial)
    g1 = 1.0 + 0.1 * jax.random.normal(ks[2], (ci,), jnp.float32)
    be1 = 0.1 * jax.random.normal(ks[3], (ci,), jnp.float32)
    m1 = 0.1 * jax.random.normal(ks[4], (ci,), jnp.float32)
    v1 = 1.0 + 0.1 * jax.random.uniform(ks[5], (ci,), jnp.float32)
    # conv2: Conv2d(ci, channels, 1)
    w2 = jax.random.normal(ks[6], (ci, channels), jnp.float32) * 0.05
    b2 = jax.random.normal(ks[7], (channels,), jnp.float32) * 0.05
    # BN2
    g2 = 1.0 + 0.1 * jax.random.normal(ks[8], (channels,), jnp.float32)
    be2 = 0.1 * jax.random.normal(ks[9], (channels,), jnp.float32)
    m2 = jnp.zeros((channels,), jnp.float32)
    v2 = jnp.ones((channels,), jnp.float32)

    w1_eff, b1_eff = fold_bn(w1, b1, g1, be1, m1, v1)  # (2C, Ci), (Ci,)
    w2_eff, b2_eff = fold_bn(w2, b2, g2, be2, m2, v2)  # (Ci, C), (C,)

    # Kernel wants output-major (transposed) weights for the NCHW layout.
    w1xT = w1_eff[:channels, :].T  # (Ci, C)  -- x half of the channel concat
    w1yT = w1_eff[channels:, :].T  # (Ci, C)  -- ds_y half
    w2T = w2_eff.T                 # (C, Ci)
    return (w1xT, w1yT, b1_eff.reshape(ci, 1), w2T, b2_eff.reshape(channels, 1))


def aff_reference(x, y, w1xT, w1yT, b1, w2T, b2):
    """Pure-JAX f32 reference of the same math (module semantics)."""
    B, C, H, W = x.shape
    x3 = x.reshape(B, C, -1).astype(jnp.float32)
    y3 = y.reshape(B, C, -1).astype(jnp.float32)
    h = (jnp.einsum("ic,bcm->bim", w1xT, x3)
         + jnp.einsum("ic,bcm->bim", w1yT, y3) + b1[None])
    h = h * jax.nn.sigmoid(h)
    z = jnp.einsum("ci,bim->bcm", w2T, h) + b2[None]
    att = 1.0 + jnp.tanh(z)
    o = x3 * att + y3 * (2.0 - att)
    return o.reshape(B, C, H, W)


if __name__ == "__main__":
    channels, r = 64, 4  # module defaults -> inter_channels = 16
    key = jax.random.PRNGKey(0)
    kx, ky, kp = jax.random.split(key, 3)
    params = make_params(kp, channels, r)

    # Tolerances: the kernel uses bf16 MXU operands (f32 accumulation), so the
    # attention gate carries ~1e-3 absolute error vs. the pure-f32 reference.
    TOL_F32 = dict(atol=2e-2, rtol=2e-2)
    TOL_BF16 = dict(atol=6e-2, rtol=6e-2)

    # Case 1: f32 activations, HW a multiple of 128 (batch axis feeds the grid
    # so both v7x TensorCores get work).
    B, H, W = 2, 16, 16
    x = jax.random.normal(kx, (B, channels, H, W), jnp.float32)
    ds_y = jax.random.normal(ky, (B, channels, H, W), jnp.float32)
    out = jax.block_until_ready(aff_forward(x, ds_y, *params))
    ref = aff_reference(x, ds_y, *params)
    assert out.shape == (B, channels, H, W)
    assert jnp.allclose(out, ref, **TOL_F32), "f32 mismatch vs reference"

    # Case 2: spatial extent not a multiple of the tile (cdiv + partial tile).
    B2, H2, W2 = 1, 12, 12  # HW = 144 -> one full 128-wide tile + partial tile
    x2 = jax.random.normal(jax.random.fold_in(kx, 1),
                           (B2, channels, H2, W2), jnp.float32)
    y2 = jax.random.normal(jax.random.fold_in(ky, 1),
                           (B2, channels, H2, W2), jnp.float32)
    out2 = jax.block_until_ready(aff_forward(x2, y2, *params, tm=128))
    ref2 = aff_reference(x2, y2, *params)
    assert jnp.allclose(out2, ref2, **TOL_F32), "partial-tile mismatch"

    # Case 3: bf16 activations in HBM (halves bandwidth); f32 accum in-kernel.
    xb = x.astype(jnp.bfloat16)
    yb = ds_y.astype(jnp.bfloat16)
    outb = jax.block_until_ready(aff_forward(xb, yb, *params))
    refb = aff_reference(xb, yb, *params)  # reference on the same rounded inputs
    assert outb.dtype == jnp.bfloat16
    assert jnp.allclose(outb.astype(jnp.float32), refb, **TOL_BF16), \
        "bf16 mismatch vs reference"

    # Case 4: small feature map + batch blocking (BB > 1, partial batch block).
    B4, H4, W4 = 5, 8, 8  # HW = 64 -> bb = 4, grid (2, 1), last block partial
    x4 = jax.random.normal(jax.random.fold_in(kx, 2),
                           (B4, channels, H4, W4), jnp.float32)
    y4 = jax.random.normal(jax.random.fold_in(ky, 2),
                           (B4, channels, H4, W4), jnp.float32)
    out4 = jax.block_until_ready(aff_forward(x4, y4, *params))
    ref4 = aff_reference(x4, y4, *params)
    assert jnp.allclose(out4, ref4, **TOL_F32), "batch-block mismatch"

    print("KERNEL_OK")
</pallas_src>

<mosaic_0001>
module attributes {stable_mosaic.version = 11 : i64} {
  func.func @aff_kernel(%arg0: i32, %arg1: i32, %arg2: memref<1x64x256xf32, #tpu.memory_space<vmem>>, %arg3: memref<1x64x256xf32, #tpu.memory_space<vmem>>, %arg4: memref<16x64xbf16, #tpu.memory_space<vmem>>, %arg5: memref<16x64xbf16, #tpu.memory_space<vmem>>, %arg6: memref<16x1xf32, #tpu.memory_space<vmem>>, %arg7: memref<64x16xbf16, #tpu.memory_space<vmem>>, %arg8: memref<64x1xf32, #tpu.memory_space<vmem>>, %arg9: memref<1x64x256xf32, #tpu.memory_space<vmem>>) attributes {dimension_semantics = [#tpu.dimension_semantics<parallel>, #tpu.dimension_semantics<parallel>], iteration_bounds = array<i64: 2, 1>, scalar_prefetch = 0 : i64, scratch_operands = 0 : i64, tpu.core_type = #tpu.core_type<tc>, window_params = [{transform_indices = @transform_0, window_bounds = array<i64: 1, 64, 256>}, {transform_indices = @transform_1, window_bounds = array<i64: 1, 64, 256>}, {pipeline_mode = #tpu.pipeline_mode<synchronous>, transform_indices = @transform_2, window_bounds = array<i64: 16, 64>}, {pipeline_mode = #tpu.pipeline_mode<synchronous>, transform_indices = @transform_3, window_bounds = array<i64: 16, 64>}, {pipeline_mode = #tpu.pipeline_mode<synchronous>, transform_indices = @transform_4, window_bounds = array<i64: 16, 1>}, {pipeline_mode = #tpu.pipeline_mode<synchronous>, transform_indices = @transform_5, window_bounds = array<i64: 64, 16>}, {pipeline_mode = #tpu.pipeline_mode<synchronous>, transform_indices = @transform_6, window_bounds = array<i64: 64, 1>}, {transform_indices = @transform_7, window_bounds = array<i64: 1, 64, 256>}]} {
    %c0 = arith.constant 0 : index
    %c0_0 = arith.constant 0 : index
    %0 = vector.load %arg4[%c0, %c0_0] : memref<16x64xbf16, #tpu.memory_space<vmem>>, vector<16x64xbf16>
    %c0_1 = arith.constant 0 : index
    %c0_2 = arith.constant 0 : index
    %1 = vector.load %arg5[%c0_1, %c0_2] : memref<16x64xbf16, #tpu.memory_space<vmem>>, vector<16x64xbf16>
    %c0_3 = arith.constant 0 : index
    %c0_4 = arith.constant 0 : index
    %2 = vector.load %arg6[%c0_3, %c0_4] : memref<16x1xf32, #tpu.memory_space<vmem>>, vector<16x1xf32>
    %c0_5 = arith.constant 0 : index
    %c0_6 = arith.constant 0 : index
    %3 = vector.load %arg7[%c0_5, %c0_6] : memref<64x16xbf16, #tpu.memory_space<vmem>>, vector<64x16xbf16>
    %c0_7 = arith.constant 0 : index
    %c0_8 = arith.constant 0 : index
    %4 = vector.load %arg8[%c0_7, %c0_8] : memref<64x1xf32, #tpu.memory_space<vmem>>, vector<64x1xf32>
    %c0_9 = arith.constant 0 : index
    %c0_10 = arith.constant 0 : index
    %c0_11 = arith.constant 0 : index
    %5 = vector.load %arg2[%c0_9, %c0_10, %c0_11] : memref<1x64x256xf32, #tpu.memory_space<vmem>>, vector<1x64x256xf32>
    %6 = vector.shape_cast %5 : vector<1x64x256xf32> to vector<64x256xf32>
    %7 = arith.truncf %6 : vector<64x256xf32> to vector<64x256xbf16>
    %c0_12 = arith.constant 0 : index
    %c0_13 = arith.constant 0 : index
    %c0_14 = arith.constant 0 : index
    %8 = vector.load %arg3[%c0_12, %c0_13, %c0_14] : memref<1x64x256xf32, #tpu.memory_space<vmem>>, vector<1x64x256xf32>
    %9 = vector.shape_cast %8 : vector<1x64x256xf32> to vector<64x256xf32>
    %10 = arith.truncf %9 : vector<64x256xf32> to vector<64x256xbf16>
    %cst = arith.constant dense<0.000000e+00> : vector<16x256xf32>
    %11 = tpu.matmul %0, %7, %cst {dimension_numbers = #tpu.dot_dimension_numbers<[1], [0], [0], [1], [0, 0, 1, 1], [], []>} : vector<16x64xbf16>, vector<64x256xbf16>, vector<16x256xf32> -> vector<16x256xf32>
    %cst_15 = arith.constant dense<0.000000e+00> : vector<16x256xf32>
    %12 = tpu.matmul %1, %10, %cst_15 {dimension_numbers = #tpu.dot_dimension_numbers<[1], [0], [0], [1], [0, 0, 1, 1], [], []>} : vector<16x64xbf16>, vector<64x256xbf16>, vector<16x256xf32> -> vector<16x256xf32>
    %13 = arith.addf %11, %12 : vector<16x256xf32>
    %14 = vector.broadcast %2 : vector<16x1xf32> to vector<16x256xf32>
    %15 = arith.addf %13, %14 : vector<16x256xf32>
    %16 = arith.negf %15 : vector<16x256xf32>
    %17 = math.exp %16 : vector<16x256xf32>
    %cst_16 = arith.constant 1.000000e+00 : f32
    %18 = vector.broadcast %cst_16 : f32 to vector<16x256xf32>
    %19 = arith.addf %18, %17 : vector<16x256xf32>
    %20 = arith.divf %18, %19 : vector<16x256xf32>
    %21 = arith.mulf %15, %20 : vector<16x256xf32>
    %22 = arith.truncf %21 : vector<16x256xf32> to vector<16x256xbf16>
    %cst_17 = arith.constant dense<0.000000e+00> : vector<64x256xf32>
    %23 = tpu.matmul %3, %22, %cst_17 {dimension_numbers = #tpu.dot_dimension_numbers<[1], [0], [0], [1], [0, 0, 1, 1], [], []>} : vector<64x16xbf16>, vector<16x256xbf16>, vector<64x256xf32> -> vector<64x256xf32>
    %24 = vector.broadcast %4 : vector<64x1xf32> to vector<64x256xf32>
    %25 = arith.addf %23, %24 : vector<64x256xf32>
    %26 = math.tanh %25 : vector<64x256xf32>
    %c0_18 = arith.constant 0 : index
    %c0_19 = arith.constant 0 : index
    %c0_20 = arith.constant 0 : index
    %27 = vector.load %arg2[%c0_18, %c0_19, %c0_20] : memref<1x64x256xf32, #tpu.memory_space<vmem>>, vector<1x64x256xf32>
    %28 = vector.shape_cast %27 : vector<1x64x256xf32> to vector<64x256xf32>
    %c0_21 = arith.constant 0 : index
    %c0_22 = arith.constant 0 : index
    %c0_23 = arith.constant 0 : index
    %29 = vector.load %arg3[%c0_21, %c0_22, %c0_23] : memref<1x64x256xf32, #tpu.memory_space<vmem>>, vector<1x64x256xf32>
    %30 = vector.shape_cast %29 : vector<1x64x256xf32> to vector<64x256xf32>
    %31 = arith.addf %28, %30 : vector<64x256xf32>
    %32 = arith.subf %28, %30 : vector<64x256xf32>
    %33 = arith.mulf %32, %26 : vector<64x256xf32>
    %34 = arith.addf %31, %33 : vector<64x256xf32>
    %c0_24 = arith.constant 0 : index
    %c0_25 = arith.constant 0 : index
    %c0_26 = arith.constant 0 : index
    %35 = vector.load %arg9[%c0_24, %c0_25, %c0_26] : memref<1x64x256xf32, #tpu.memory_space<vmem>>, vector<1x64x256xf32>
    %36 = vector.shape_cast %35 : vector<1x64x256xf32> to vector<64x256xf32>
    %37 = vector.shape_cast %34 : vector<64x256xf32> to vector<1x64x256xf32>
    tpu.vector_store %arg9[%c0_24, %c0_25, %c0_26], %37 {strides = array<i32>} : memref<1x64x256xf32, #tpu.memory_space<vmem>>, vector<1x64x256xf32>,
    return
  }
  func.func @transform_0(%arg0: i32, %arg1: i32) -> (i32, i32, i32) {
    %c0_i32 = arith.constant 0 : i32
    %c0_i32_0 = arith.constant 0 : i32
    return %arg0, %c0_i32, %arg1 : i32, i32, i32
  }
  func.func @transform_1(%arg0: i32, %arg1: i32) -> (i32, i32, i32) {
    %c0_i32 = arith.constant 0 : i32
    %c0_i32_0 = arith.constant 0 : i32
    return %arg0, %c0_i32, %arg1 : i32, i32, i32
  }
  func.func @transform_2(%arg0: i32, %arg1: i32) -> (i32, i32) {
    %c0_i32 = arith.constant 0 : i32
    %c0_i32_0 = arith.constant 0 : i32
    %c0_i32_1 = arith.constant 0 : i32
    return %c0_i32, %c0_i32_0 : i32, i32
  }
  func.func @transform_3(%arg0: i32, %arg1: i32) -> (i32, i32) {
    %c0_i32 = arith.constant 0 : i32
    %c0_i32_0 = arith.constant 0 : i32
    %c0_i32_1 = arith.constant 0 : i32
    return %c0_i32, %c0_i32_0 : i32, i32
  }
  func.func @transform_4(%arg0: i32, %arg1: i32) -> (i32, i32) {
    %c0_i32 = arith.constant 0 : i32
    %c0_i32_0 = arith.constant 0 : i32
    %c0_i32_1 = arith.constant 0 : i32
    return %c0_i32, %c0_i32_0 : i32, i32
  }
  func.func @transform_5(%arg0: i32, %arg1: i32) -> (i32, i32) {
    %c0_i32 = arith.constant 0 : i32
    %c0_i32_0 = arith.constant 0 : i32
    %c0_i32_1 = arith.constant 0 : i32
    return %c0_i32, %c0_i32_0 : i32, i32
  }
  func.func @transform_6(%arg0: i32, %arg1: i32) -> (i32, i32) {
    %c0_i32 = arith.constant 0 : i32
    %c0_i32_0 = arith.constant 0 : i32
    %c0_i32_1 = arith.constant 0 : i32
    return %c0_i32, %c0_i32_0 : i32, i32
  }
  func.func @transform_7(%arg0: i32, %arg1: i32) -> (i32, i32, i32) {
    %c0_i32 = arith.constant 0 : i32
    %c0_i32_0 = arith.constant 0 : i32
    return %arg0, %c0_i32, %arg1 : i32, i32, i32
  }
}

</mosaic_0001>

<bundles_post_ra>
// kernel: aff_forward.1
= control target key start
LH: loop header
LB: loop body
LE: loop exit
PB: predicated region body
PF: predicated region fallthrough
CT: control target
= control target key end

     0   :  { %s1101_s24 = smov 0   ;;  %s1103_s25 = smov 0   ;;  %s1510_s0 = inlined_call_operand.vmem [shape: f32[2,64,256], index: 0, kind: input, shape index: {}]   ;;  %s1511_s1 = inlined_call_operand.vmem [shape: f32[2,64,256], index: 1, kind: input, shape index: {}]   ;;  %s1512_s2 = inlined_call_operand.vmem [shape: bf16[16,64], index: 2, kind: input, shape index: {}]   ;;  %s1513_s3 = inlined_call_operand.vmem [shape: bf16[16,64], index: 3, kind: input, shape index: {}]   ;;  %s1514_s4 = inlined_call_operand.vmem [shape: f32[16,1], index: 4, kind: input, shape index: {}]   ;;  %s1515_s5 = inlined_call_operand.vmem [shape: bf16[64,16], index: 5, kind: input, shape index: {}]   ;;  %s1516_s6 = inlined_call_operand.vmem [shape: f32[64,1], index: 6, kind: input, shape index: {}]   ;;  %s1517_s7 = inlined_call_operand.vmem [shape: f32[2,64,256], index: 7, kind: output, shape index: {}]  }
   0x1   :  { %s1105_s26 = smov 0  }
   0x2 LB: > { %s29_s27 = sadd.s32 1, %s1054_s25  ;;  %p923_p0 = scmp.ge.s32.totalorder %s1058_s26, 1  ;;  %s1058_s26 = sphi %s1105_s26, %s17_s26   ;;  %s1054_s25 = sphi %s1103_s25, %s1553_s25   ;;  %s1050_s24 = sphi %s1101_s24, %s1552_s24  }
   0x3   : > { %p31_p1 = scmp.ge.s32.totalorder %s29_s27, 2  ;;  %p275_p2 = scmp.lt.s32.totalorder %s1058_s26, 3 }
   0x5   : > { %s1555_s27 = smov (%p31_p1, %s29_s27), 0  ;;  %p276_p3 = pnand %p923_p0, %p275_p2 }
   0x7   : > { %279 = sbr.rel (%p276_p3) target bundleno = 563 (0x233), region = 48 }
   0xe   : > { %p325_p4 = scmp.lt.s32.totalorder %s1050_s24, 1  ;;  %v1518_v0 = vmov 0   ;;  %v359_v1 = vld [vmem:[%s1514_s4] sm:$0xff]  ;;  %v360_v2 = vld [vmem:[%s1514_s4 + $0x8] sm:$0xff]  ;;  %v371_v11 = vld [vmem:[%s1516_s6 + $0x10] sm:$0xff]  ;;  %vm430_vm0 = vcmask 523264  }
   0xf   : > { %466 = vmatprep.mubr.bf16.mxu0 %v1518_v0  ;;  %980 = vset.pattern.permute.xlu0 %v1518_v0  ;;  %v373_v41 = vld [vmem:[%s1516_s6 + $0x20] sm:$0xff]  ;;  %vm632_vm1 = vcmask 130048  }
  0x10   : > { %s1557_s24 = smov (!%p325_p4, %s1050_s24), 1  ;;  %677 = vmatprep.mubr.bf16.mxu1 %v1518_v0  ;;  %981 = vset.pattern.permute.xlu1 %v1518_v0 }
  0x11   : > { %530 = vperm.xlu0 %980, %v359_v1   ;;  %s1126_s30 = sshll.u32 %s1557_s24, 7 }
  0x12   : > { %s1135_s12 = scalar_lea.vmem %s1510_s0, %s1126_s30  ;;  %s1141_s15 = scalar_lea.vmem %s1511_s1, %s1126_s30 }
  0x13   : > { %v1144_v3 = vld [vmem:[%s1135_s12 + $0x8] sm:$0xff]  ;;  %v1147_v4 = vld [vmem:[%s1135_s12 + $0x18] sm:$0xff]  ;;  %v1162_v9 = vld [vmem:[%s1135_s12] sm:$0xff]  ;;  %s1422_s8 = scalar_lea.vmem %s1517_s7, %s1126_s30 }
  0x14   : > { %v1150_v5 = vld [vmem:[%s1141_s15 + $0x8] sm:$0xff]  ;;  %v1153_v6 = vld [vmem:[%s1141_s15 + $0x18] sm:$0xff]  ;;  %v1165_v10 = vld [vmem:[%s1135_s12 + $0x10] sm:$0xff]  ;;  %v394_v44 = vpack.c.bf16 %v1147_v4, %v1144_v3 }
  0x15   : > { %v1157_v7 = vadd.f32 %v1150_v5, %v1144_v3  ;;  %535 = vperm.xlu0 %980, %v360_v2   ;;  %v418_v12 = vpack.c.bf16 %v1153_v6, %v1150_v5  ;;  %v1174_v13 = vadd.f32 %v1153_v6, %v1147_v4  ;;  %v1179_v15 = vld [vmem:[%s1141_s15] sm:$0xff]  ;;  %v1182_v16 = vld [vmem:[%s1141_s15 + $0x10] sm:$0xff]  ;;  %v1185_v17 = vld [vmem:[%s1141_s15 + $0x28] sm:$0xff]  ;;  %v393_v1 = vpack.c.bf16 %v1165_v10, %v1162_v9 }
  0x16   : > { %v417_v18 = vpack.c.bf16 %v1182_v16, %v1179_v15  ;;  %v1191_v19 = vadd.f32 %v1179_v15, %v1162_v9  ;;  %v1195_v20 = vadd.f32 %v1182_v16, %v1165_v10  ;;  %v1200_v22 = vld [vmem:[%s1141_s15 + $0x38] sm:$0xff]  ;;  %v1203_v23 = vld [vmem:[%s1135_s12 + $0x20] sm:$0xff]  ;;  %v1206_v24 = vld [vmem:[%s1135_s12 + $0x30] sm:$0xff] }
  0x17   : > { %434 = vmatprep.subr.bf16.mxu0 %v418_v12  ;;  %v420_v26 = vpack.c.bf16 %v1200_v22, %v1185_v17  ;;  %v1213_v27 = vld [vmem:[%s1141_s15 + $0x20] sm:$0xff]  ;;  %v1216_v28 = vld [vmem:[%s1141_s15 + $0x30] sm:$0xff]  ;;  %v1219_v29 = vld [vmem:[%s1141_s15 + $0x48] sm:$0xff] }
  0x18   : > { %435 = vmatpush1.bf16.msra.mxu0 %v417_v18  ;;  %v419_v30 = vpack.c.bf16 %v1216_v28, %v1213_v27  ;;  %v1225_v31 = vadd.f32 %v1213_v27, %v1203_v23  ;;  %v1229_v32 = vadd.f32 %v1216_v28, %v1206_v24  ;;  %v1234_v34 = vld [vmem:[%s1141_s15 + $0x58] sm:$0xff]  ;;  %v1237_v35 = vld [vmem:[%s1135_s12 + $0x40] sm:$0xff]  ;;  %v1244_v38 = vld [vmem:[%s1135_s12 + $0x50] sm:$0xff] }
  0x19   : > { %436 = vmatprep.subr.bf16.mxu0 %v420_v26  ;;  %v422_v37 = vpack.c.bf16 %v1234_v34, %v1219_v29  ;;  %v1247_v39 = vld [vmem:[%s1141_s15 + $0x40] sm:$0xff]  ;;  %v1250_v40 = vld [vmem:[%s1141_s15 + $0x50] sm:$0xff]  ;;  %584 = vperm.xlu0 %980, %v371_v11   ;;  %v1266_v45 = vld [vmem:[%s1141_s15 + $0x68] sm:$0xff] }
  0x1a   : > { %v1257_v42 = vadd.f32 %v1247_v39, %v1237_v35  ;;  %v1261_v43 = vadd.f32 %v1250_v40, %v1244_v38  ;;  %v1269_v46 = vld [vmem:[%s1141_s15 + $0x78] sm:$0xff]  ;;  %v1272_v47 = vld [vmem:[%s1135_s12 + $0x60] sm:$0xff]  ;;  %v1277_v49 = vld [vmem:[%s1135_s12 + $0x70] sm:$0xff]  ;;  %v421_v52 = vpack.c.bf16 %v1250_v40, %v1247_v39 }
  0x1b   : > { %1523 = vst [vmem:[#allocation2_spill] sm:$0xff] %v1269_v46  ;;  %v1280_v50 = vld [vmem:[%s1141_s15 + $0x60] sm:$0xff]  ;;  %v1283_v51 = vld [vmem:[%s1141_s15 + $0x70] sm:$0xff]  ;;  %v1298_v56 = vld [vmem:[%s1135_s12 + $0x28] sm:$0xff]  ;;  %v424_v58 = vpack.c.bf16 %v1269_v46, %v1266_v45 }
  0x1c   : > { %1524 = vst [vmem:[#allocation3_spill] sm:$0xff] %v1283_v51  ;;  %437 = vmatpush1.bf16.msra.mxu0 %v419_v30  ;;  %v1289_v53 = vadd.f32 %v1280_v50, %v1272_v47  ;;  %v1293_v54 = vadd.f32 %v1283_v51, %v1277_v49  ;;  %v1301_v57 = vld [vmem:[%s1135_s12 + $0x38] sm:$0xff]  ;;  %v1309_v60 = vadd.f32 %v1185_v17, %v1298_v56  ;;  %v1316_v62 = vld [vmem:[%s1135_s12 + $0x48] sm:$0xff] }
  0x1d   : > { %438 = vmatprep.subr.bf16.mxu0 %v422_v37  ;;  %v1313_v61 = vadd.f32 %v1200_v22, %v1301_v57  ;;  %v1323_v2 = vld [vmem:[%s1135_s12 + $0x58] sm:$0xff]  ;;  %v1327_v11 = vadd.f32 %v1219_v29, %v1316_v62  ;;  %594 = vperm.xlu0 %980, %v373_v41   ;;  %v423_v12 = vpack.c.bf16 %v1283_v51, %v1280_v50  ;;  %v1340_v37 = vld [vmem:[%s1135_s12 + $0x68] sm:$0xff]  ;;  %v375_v41 = vld [vmem:[%s1516_s6 + $0x30] sm:$0xff] }
  0x1e   : > { %1525 = vst [vmem:[#allocation4_spill] sm:$0xff] %v1293_v54  ;;  %v1333_v18 = vadd.f32 %v1234_v34, %v1323_v2  ;;  %v1343_v59 = vld [vmem:[%s1135_s12 + $0x78] sm:$0xff]  ;;  %v1350_v55 = vadd.f32 %v1266_v45, %v1340_v37  ;;  %v396_v30 = vpack.c.bf16 %v1301_v57, %v1298_v56 }
  0x1f   : > { %1526 = vst [vmem:[#allocation5_spill] sm:$0xff] %v1343_v59  ;;  %v1354_v48 = vadd.f32 %v1269_v46, %v1343_v59 }
  0x20   : > { %439 = vmatpush1.bf16.msra.mxu0 %v421_v52  ;;  %1527 = vst [vmem:[#allocation6_spill] sm:$0xff] %v1350_v55  ;;  %v982_v52 = vld [vmem:[%s1513_s3] sm:$0xff]  }
  0x21   : > { %1528 = vst [vmem:[#allocation7_spill] sm:$0xff] %v1354_v48  ;;  %440 = vmatprep.subr.bf16.mxu0 %v424_v58  ;;  %604 = vperm.xlu0 %980, %v375_v41   ;;  %v395_v58 = vpack.c.bf16 %v1206_v24, %v1203_v23  ;;  %v397_v41 = vpack.c.bf16 %v1244_v38, %v1237_v35 }
  0x24   : > { %441 = vmatpush1.bf16.msra.mxu0 %v423_v12  ;;  %v398_v12 = vpack.c.bf16 %v1323_v2, %v1316_v62 }
  0x25   : > { %485 = vmatprep.subr.bf16.mxu0 %v394_v44  ;;  %v400_v44 = vpack.c.bf16 %v1343_v59, %v1340_v37 }
  0x27   : > { %931 = vmatmul.mubr.msk.bf16.vlgmr.msra.gmra.mrb[0].mxu0 %vm430_vm0, %v982_v52  ;;  %v369_v52 = vld [vmem:[%s1516_s6] sm:$0xff] }
  0x28   : > { %486 = vmatpush1.bf16.msra.mxu0 %v393_v1  ;;  %517 = vmatprep.mubr.bf16.mxu0 %v1518_v0  ;;  %v399_v1 = vpack.c.bf16 %v1277_v49, %v1272_v47 }
  0x29   : > { %487 = vmatprep.subr.bf16.mxu0 %v396_v30  ;;  %v983_v30 = vld [vmem:[%s1512_s2] sm:$0xff]   ;;  %574 = vperm.xlu1 %981, %v369_v52  }
  0x2c   : > { %488 = vmatpush1.bf16.msra.mxu0 %v395_v58  ;;  %v370_v58 = vld [vmem:[%s1516_s6 + $0x8] sm:$0xff] }
  0x2d   : > { %489 = vmatprep.subr.bf16.mxu0 %v398_v12  ;;  %579 = vperm.xlu1 %981, %v370_v58   ;;  %v372_v12 = vld [vmem:[%s1516_s6 + $0x18] sm:$0xff] }
  0x30   : > { %490 = vmatpush1.bf16.msra.mxu0 %v397_v41  ;;  %v374_v41 = vld [vmem:[%s1516_s6 + $0x28] sm:$0xff] }
  0x31   : > { %491 = vmatprep.subr.bf16.mxu0 %v400_v44  ;;  %589 = vperm.xlu1 %981, %v372_v12   ;;  %v376_v44 = vld [vmem:[%s1516_s6 + $0x38] sm:$0xff] }
  0x34   : > { %492 = vmatpush1.bf16.msra.mxu0 %v399_v1 }
  0x35   : > { %599 = vperm.xlu1 %981, %v374_v41  }
  0x37   : > { %933 = vmatmul.mubr.msk.bf16.vlgmr.msra.gmra.mrb[0].mxu0 %vm430_vm0, %v983_v30 }
  0x39   : > { %609 = vperm.xlu1 %981, %v376_v44  }
  0x90   : > { %v531_v1 = vpop.permute.xlu0 %530 }
  0x94   : > { %v536_v58 = vpop.permute.xlu0 %535 }
 0x10a   : > { %v519_v30 = vpop.f32.mrb[0].mxu0 }
 0x10b   : > { %v538_v52 = vadd.f32 %v531_v1, %v519_v30  ;;  %v521_v26 = vpop.f32.mrb[1].mxu0 }
 0x10c   : > { %v539_v36 = vadd.f32 %v531_v1, %v521_v26  ;;  %v523_v63 = vpop.f32.mrb[2].mxu0 }
 0x10d   : > { %v934_v33 = vmul.f32 -1.442695, %v538_v52  ;;  %v540_v14 = vadd.f32 %v536_v58, %v523_v63  ;;  %v525_v12 = vpop.f32.mrb[3].mxu0 }
 0x10e   : > { %v935_v25 = vmul.f32 -1.442695, %v539_v36  ;;  %v541_v8 = vadd.f32 %v536_v58, %v525_v12 }
 0x10f   : > { %988 = vpow2.f32 %v934_v33  ;;  %v936_v21 = vmul.f32 -1.442695, %v540_v14 }
 0x110   : > { %990 = vpow2.f32 %v935_v25  ;;  %v937_v41 = vmul.f32 -1.442695, %v541_v8 }
 0x111   : > { %992 = vpow2.f32 %v936_v21 }
 0x112   : > { %994 = vpow2.f32 %v937_v41 }
 0x119   : > { %v989_v0 = vpop.eup %988 }
 0x11a   : > { %v991_v44 = vpop.eup %990  ;;  %v554_v48 = vadd.f32 1.0, %v989_v0  ;;  %v984_v0 = vld [vmem:[%s1515_s5] sm:$0xff]  }
 0x11b   : > { %v993_v54 = vpop.eup %992  ;;  %v555_v30 = vadd.f32 1.0, %v991_v44 }
 0x11c   : > { %v995_v46 = vpop.eup %994  ;;  %996 = vrcp.f32 %v554_v48  ;;  %v556_v26 = vadd.f32 1.0, %v993_v54  ;;  %v985_v48 = vld [vmem:[%s1515_s5 + $0x8] sm:$0xff]  }
 0x11d   : > { %998 = vrcp.f32 %v555_v30  ;;  %v557_v1 = vadd.f32 1.0, %v995_v46  ;;  %v1529_v46 = vmov 0  }
 0x11e   : > { %1000 = vrcp.f32 %v556_v26 }
 0x11f   : > { %1002 = vrcp.f32 %v557_v1 }
 0x126   : > { %v997_v63 = vpop.eup %996 }
 0x127   : > { %v999_v58 = vpop.eup %998  ;;  %v566_v25 = vmul.f32 %v997_v63, %v538_v52  ;;  %v585_v63 = vpop.permute.xlu0 %584 }
 0x128   : > { %v1001_v33 = vpop.eup %1000  ;;  %v567_v21 = vmul.f32 %v999_v58, %v539_v36  ;;  %v575_v36 = vpop.permute.xlu1 %574 }
 0x129   : > { %v1003_v12 = vpop.eup %1002  ;;  %v568_v59 = vmul.f32 %v1001_v33, %v540_v14  ;;  %v987_v14 = vld [vmem:[%s1515_s5 + $0x18] sm:$0xff]  }
 0x12a   : > { %v569_v41 = vmul.f32 %v1003_v12, %v541_v8  ;;  %v986_v8 = vld [vmem:[%s1515_s5 + $0x10] sm:$0xff]  }
 0x12b   : > { %v570_v55 = vpack.c.bf16 %v568_v59, %v566_v25 }
 0x12c   : > { %v571_v51 = vpack.c.bf16 %v569_v41, %v567_v21  ;;  %v580_v59 = vpop.permute.xlu1 %579 }
 0x12e   : > { %645 = vmatprep.subr.bf16.mxu1 %v571_v51 }
 0x12f   : > { %646 = vmatpush1.bf16.msra.mxu1 %v570_v55 }
 0x130   : > { %v590_v25 = vpop.permute.xlu1 %589 }
 0x132   : > { %942 = vmatmul.mubr.msk.bf16.vlgmr.msra.gmra.mrb[0].mxu1 %vm632_vm1, %v984_v0 }
 0x133   : > { %687 = vmatprep.mubr.bf16.mxu1 %v1529_v46 }
 0x13a   : > { %943 = vmatmul.mubr.msk.bf16.gmra.mrb[4].mxu1 %vm632_vm1, %v985_v48 }
 0x13b   : > { %697 = vmatprep.mubr.bf16.mxu1 %v1529_v46 }
 0x142   : > { %944 = vmatmul.mubr.msk.bf16.gmra.mrb[8].mxu1 %vm632_vm1, %v986_v8 }
 0x143   : > { %707 = vmatprep.mubr.bf16.mxu1 %v1529_v46 }
 0x14a   : > { %945 = vmatmul.mubr.msk.bf16.gmra.mrb[12].mxu1 %vm632_vm1, %v987_v14 }
 0x205   : > { %v679_v51 = vpop.f32.mrb[0].mxu1 }
 0x206   : > { %v680_v54 = vadd.f32 %v679_v51, %v575_v36  ;;  %v681_v55 = vpop.f32.mrb[1].mxu1 }
 0x207   : > { %v682_v52 = vadd.f32 %v681_v55, %v575_v36  ;;  %v683_v44 = vpop.f32.mrb[2].mxu1  ;;  %v1530_v36 = vsub.f32 %v1162_v9, %v1179_v15  ;;  %v1531_v55 = vsub.f32 %v1144_v3, %v1150_v5  ;;  %v1532_v9 = vsub.f32 %v1165_v10, %v1182_v16 }
 0x208   : > { %1004 = vtanh.f32 %v680_v54  ;;  %v684_v30 = vadd.f32 %v683_v44, %v580_v59  ;;  %v685_v26 = vpop.f32.mrb[3].mxu1  ;;  %v595_v44 = vpop.permute.xlu0 %594 }
 0x209   : > { %1006 = vtanh.f32 %v682_v52  ;;  %v686_v1 = vadd.f32 %v685_v26, %v580_v59 }
 0x20a   : > { %1008 = vtanh.f32 %v684_v30 }
 0x20b   : > { %1010 = vtanh.f32 %v686_v1 }
 0x20d   : > { %v689_v58 = vpop.f32.mrb[4].mxu1 }
 0x20e   : > { %v690_v33 = vadd.f32 %v689_v58, %v585_v63  ;;  %v691_v12 = vpop.f32.mrb[5].mxu1 }
 0x20f   : > { %v692_v21 = vadd.f32 %v691_v12, %v585_v63  ;;  %v693_v41 = vpop.f32.mrb[6].mxu1  ;;  %v1533_v63 = vsub.f32 %v1147_v4, %v1153_v6  ;;  %v600_v12 = vpop.permute.xlu1 %599 }
 0x210   : > { %1012 = vtanh.f32 %v690_v33  ;;  %v694_v0 = vadd.f32 %v693_v41, %v590_v25  ;;  %v695_v46 = vpop.f32.mrb[7].mxu1 }
 0x211   : > { %1014 = vtanh.f32 %v692_v21  ;;  %v696_v48 = vadd.f32 %v695_v46, %v590_v25 }
 0x212   : > { %v1005_v8 = vpop.eup %1004  ;;  %1016 = vtanh.f32 %v694_v0 }
 0x213   : > { %v1007_v14 = vpop.eup %1006  ;;  %v766_v51 = vmul.f32 %v1005_v8, %v1530_v36  ;;  %1018 = vtanh.f32 %v696_v48  ;;  %v605_v8 = vpop.permute.xlu0 %604  ;;  %v1536_v36 = vsub.f32 %v1206_v24, %v1216_v28 }
 0x214   : > { %v1009_v54 = vpop.eup %1008  ;;  %v767_v59 = vmul.f32 %v1007_v14, %v1531_v55 }
 0x215   : > { %v1011_v52 = vpop.eup %1010  ;;  %v782_v30 = vadd.f32 %v766_v51, %v1191_v19  ;;  %v768_v15 = vmul.f32 %v1009_v54, %v1532_v9  ;;  %v699_v26 = vpop.f32.mrb[8].mxu1 }
 0x216   : > { %v783_v1 = vadd.f32 %v767_v59, %v1157_v7  ;;  %v769_v58 = vmul.f32 %v1011_v52, %v1533_v63  ;;  %v700_v3 = vadd.f32 %v699_v26, %v595_v44  ;;  %v701_v5 = vpop.f32.mrb[9].mxu1  ;;  %v610_v52 = vpop.permute.xlu1 %609 }
 0x217   : > { %798 = vst [vmem:[%s1422_s8] sm:$0xff] %v782_v30  ;;  %v784_v33 = vadd.f32 %v768_v15, %v1195_v20  ;;  %v702_v19 = vadd.f32 %v701_v5, %v595_v44  ;;  %v703_v25 = vpop.f32.mrb[10].mxu1  ;;  %v1534_v20 = vsub.f32 %v1203_v23, %v1213_v27  ;;  %v1537_v27 = vsub.f32 %v1301_v57, %v1200_v22 }
 0x218   : > { %799 = vst [vmem:[%s1422_s8 + $0x8] sm:$0xff] %v783_v1  ;;  %v785_v10 = vadd.f32 %v769_v58, %v1174_v13  ;;  %1020 = vtanh.f32 %v700_v3  ;;  %v704_v16 = vadd.f32 %v703_v25, %v600_v12  ;;  %v705_v21 = vpop.f32.mrb[11].mxu1  ;;  %v1535_v13 = vsub.f32 %v1298_v56, %v1185_v17 }
 0x219   : > { %800 = vst [vmem:[%s1422_s8 + $0x10] sm:$0xff] %v784_v33  ;;  %1022 = vtanh.f32 %v702_v19  ;;  %v706_v7 = vadd.f32 %v705_v21, %v600_v12  ;;  %v1539_v15 = vsub.f32 %v1316_v62, %v1219_v29  ;;  %v1540_v58 = vsub.f32 %v1244_v38, %v1250_v40  ;;  %v1547_v21 = vld [vmem:[#allocation5_spill] sm:$0xff] }
 0x21a   : > { %v1013_v4 = vpop.eup %1012  ;;  %801 = vst [vmem:[%s1422_s8 + $0x18] sm:$0xff] %v785_v10  ;;  %1024 = vtanh.f32 %v704_v16  ;;  %v1542_v40 = vsub.f32 %v1272_v47, %v1280_v50  ;;  %v1546_v10 = vld [vmem:[#allocation6_spill] sm:$0xff]  ;;  %v1550_v47 = vld [vmem:[#allocation4_spill] sm:$0xff] }
 0x21b   : > { %v1015_v6 = vpop.eup %1014  ;;  %v770_v41 = vmul.f32 %v1013_v4, %v1534_v20  ;;  %1026 = vtanh.f32 %v706_v7  ;;  %v1548_v7 = vld [vmem:[#allocation2_spill] sm:$0xff]  ;;  %v1551_v20 = vld [vmem:[#allocation7_spill] sm:$0xff] }
 0x21c   : > { %v1017_v0 = vpop.eup %1016  ;;  %v771_v46 = vmul.f32 %v1015_v6, %v1535_v13  ;;  %v1549_v4 = vsub.f32 %v1547_v21, %v1548_v7 }
 0x21d   : > { %v1019_v48 = vpop.eup %1018  ;;  %v786_v14 = vadd.f32 %v770_v41, %v1225_v31  ;;  %v772_v51 = vmul.f32 %v1017_v0, %v1536_v36  ;;  %v709_v54 = vpop.f32.mrb[12].mxu1 }
 0x21e   : > { %v787_v23 = vadd.f32 %v771_v46, %v1309_v60  ;;  %v773_v55 = vmul.f32 %v1019_v48, %v1537_v27  ;;  %v710_v59 = vadd.f32 %v709_v54, %v605_v8  ;;  %v711_v17 = vpop.f32.mrb[13].mxu1 }
 0x21f   : > { %802 = vst [vmem:[%s1422_s8 + $0x20] sm:$0xff] %v786_v14  ;;  %v788_v56 = vadd.f32 %v772_v51, %v1229_v32  ;;  %v712_v31 = vadd.f32 %v711_v17, %v605_v8  ;;  %v713_v44 = vpop.f32.mrb[14].mxu1  ;;  %v1538_v32 = vsub.f32 %v1237_v35, %v1247_v39  ;;  %v1541_v35 = vsub.f32 %v1323_v2, %v1234_v34 }
 0x220   : > { %803 = vst [vmem:[%s1422_s8 + $0x28] sm:$0xff] %v787_v23  ;;  %v789_v24 = vadd.f32 %v773_v55, %v1313_v61  ;;  %1028 = vtanh.f32 %v710_v59  ;;  %v714_v28 = vadd.f32 %v713_v44, %v610_v52  ;;  %v715_v30 = vpop.f32.mrb[15].mxu1  ;;  %v1543_v2 = vsub.f32 %v1340_v37, %v1266_v45 }
 0x221   : > { %804 = vst [vmem:[%s1422_s8 + $0x30] sm:$0xff] %v788_v56  ;;  %1030 = vtanh.f32 %v712_v31  ;;  %v716_v22 = vadd.f32 %v715_v30, %v610_v52 }
 0x222   : > { %v1021_v57 = vpop.eup %1020  ;;  %805 = vst [vmem:[%s1422_s8 + $0x38] sm:$0xff] %v789_v24  ;;  %1032 = vtanh.f32 %v714_v28 }
 0x223   : > { %v1023_v60 = vpop.eup %1022  ;;  %v774_v9 = vmul.f32 %v1021_v57, %v1538_v32  ;;  %1034 = vtanh.f32 %v716_v22 }
 0x224   : > { %v1025_v61 = vpop.eup %1024  ;;  %v775_v26 = vmul.f32 %v1023_v60, %v1539_v15 }
 0x225   : > { %v1027_v1 = vpop.eup %1026  ;;  %v790_v63 = vadd.f32 %v774_v9, %v1257_v42  ;;  %v776_v3 = vmul.f32 %v1025_v61, %v1540_v58 }
 0x226   : > { %v791_v5 = vadd.f32 %v775_v26, %v1327_v11  ;;  %v777_v39 = vmul.f32 %v1027_v1, %v1541_v35 }
 0x227   : > { %806 = vst [vmem:[%s1422_s8 + $0x40] sm:$0xff] %v790_v63  ;;  %v792_v33 = vadd.f32 %v776_v3, %v1261_v43 }
 0x228   : > { %807 = vst [vmem:[%s1422_s8 + $0x48] sm:$0xff] %v791_v5  ;;  %v793_v29 = vadd.f32 %v777_v39, %v1333_v18  ;;  %v1544_v18 = vld [vmem:[#allocation3_spill] sm:$0xff] }
 0x229   : > { %808 = vst [vmem:[%s1422_s8 + $0x50] sm:$0xff] %v792_v33  ;;  %v1545_v19 = vsub.f32 %v1277_v49, %v1544_v18 }
 0x22a   : > { %v1029_v42 = vpop.eup %1028  ;;  %809 = vst [vmem:[%s1422_s8 + $0x58] sm:$0xff] %v793_v29 }
 0x22b   : > { %v1031_v38 = vpop.eup %1030  ;;  %v778_v62 = vmul.f32 %v1029_v42, %v1542_v40 }
 0x22c   : > { %v1033_v34 = vpop.eup %1032  ;;  %v779_v11 = vmul.f32 %v1031_v38, %v1543_v2 }
 0x22d   : > { %v1035_v43 = vpop.eup %1034  ;;  %v794_v12 = vadd.f32 %v778_v62, %v1289_v53  ;;  %v780_v25 = vmul.f32 %v1033_v34, %v1545_v19 }
 0x22e   : > { %v795_v16 = vadd.f32 %v779_v11, %v1546_v10  ;;  %v781_v6 = vmul.f32 %v1035_v43, %v1549_v4 }
 0x22f   : > { %810 = vst [vmem:[%s1422_s8 + $0x60] sm:$0xff] %v794_v12  ;;  %v796_v50 = vadd.f32 %v780_v25, %v1550_v47 }
 0x230   : > { %811 = vst [vmem:[%s1422_s8 + $0x68] sm:$0xff] %v795_v16  ;;  %v797_v45 = vadd.f32 %v781_v6, %v1551_v20 }
 0x231   : > { %812 = vst [vmem:[%s1422_s8 + $0x70] sm:$0xff] %v796_v50 }
 0x232   : > { %813 = vst [vmem:[%s1422_s8 + $0x78] sm:$0xff] %v797_v45 }
 0x233 PF: > { %s17_s26 = sadd.s32 1, %s1058_s26   ;;  %s1552_s24 = smov %s1054_s25 }
 0x234   : > { %p14_p5 = scmp.ge.s32.totalorder %s17_s26, 4   ;;  %s1553_s25 = smov %s1555_s27 }
 0x236   :  { %16 = sbr.rel (!%p14_p5) target bundleno = 2 (0x2), region = 81 }

</bundles_post_ra>
